<compile_context>
chip_gen: v7x
topology: tpu7x:2x2x1
jax: 0.10.0
libtpu: 0.0.40
codegen_flags: <defaults>
</compile_context>

<pallas_src>
import jax
import jax.numpy as jnp
from jax.experimental import pallas as pl
from jax.experimental.pallas import tpu as pltpu

BN_EPS = 1e-5


def _round_up(x, m):
    return ((x + m - 1) // m) * m


def _pick_tile_k(ckk_p, cap=1024):
    """Largest multiple-of-128 divisor of ckk_p that is <= cap."""
    if ckk_p <= cap:
        return ckk_p
    for cand in range(cap, 0, -128):
        if ckk_p % cand == 0:
            return cand
    return 128


def _vmem_limit_bytes():
    # 3/4 of physical VMEM, capped: v5e/v6e (128 MiB) -> 96 MiB, v7x (64 MiB) -> 48 MiB.
    try:
        cap = int(pltpu.get_tpu_info().vmem_capacity_bytes)
    except Exception:
        cap = 64 * 1024 * 1024
    return int(max(32 * 1024 * 1024, min((cap * 3) // 4, 112 * 1024 * 1024)))


# ---------------- pass 1 (fusion path): per-tile BN partial stats only ----------------
def _stats_only_kernel(p_ref, w_ref, stats_ref, acc_ref):
    k = pl.program_id(1)

    @pl.when(k == 0)
    def _():
        acc_ref[...] = jnp.zeros_like(acc_ref)

    acc_ref[...] += jnp.dot(p_ref[...], w_ref[...], preferred_element_type=jnp.float32)

    @pl.when(k == pl.num_programs(1) - 1)
    def _():
        y = acc_ref[...]
        s = jnp.sum(y, axis=0, keepdims=True)        # [1, C_out_p]
        sq = jnp.sum(y * y, axis=0, keepdims=True)   # [1, C_out_p]
        stats_ref[...] = jnp.concatenate([s, sq], axis=0)[None]   # [1, 2, C_out_p]


# ---------------- pass 1 (fallback path): bf16 conv intermediate + stats ----------------
def _conv_stats_kernel(p_ref, w_ref, y_ref, stats_ref, acc_ref):
    k = pl.program_id(1)

    @pl.when(k == 0)
    def _():
        acc_ref[...] = jnp.zeros_like(acc_ref)

    acc_ref[...] += jnp.dot(p_ref[...], w_ref[...], preferred_element_type=jnp.float32)

    @pl.when(k == pl.num_programs(1) - 1)
    def _():
        y = acc_ref[...]
        s = jnp.sum(y, axis=0, keepdims=True)
        sq = jnp.sum(y * y, axis=0, keepdims=True)
        stats_ref[...] = jnp.concatenate([s, sq], axis=0)[None]
        y_ref[...] = y.astype(y_ref.dtype)           # bf16 store (stats already f32)


# ---------------- pass 2 (fusion path): recompute conv + BN affine + ReLU6 ----------------
def _fused_conv_bn_relu6_kernel(p_ref, w_ref, scale_ref, shift_ref, o_ref, acc_ref):
    k = pl.program_id(1)

    @pl.when(k == 0)
    def _():
        acc_ref[...] = jnp.zeros_like(acc_ref)

    acc_ref[...] += jnp.dot(p_ref[...], w_ref[...], preferred_element_type=jnp.float32)

    @pl.when(k == pl.num_programs(1) - 1)
    def _():
        o_ref[...] = jnp.clip(
            acc_ref[...] * scale_ref[...] + shift_ref[...], 0.0, 6.0
        ).astype(o_ref.dtype)


# ---------------- pass 2 (fallback path): BN affine + ReLU6 on stored bf16 conv ----------------
def _bn_relu6_kernel(y_ref, scale_ref, shift_ref, o_ref):
    y = y_ref[...].astype(jnp.float32)
    o_ref[...] = jnp.clip(y * scale_ref[...] + shift_ref[...], 0.0, 6.0).astype(o_ref.dtype)


def conv_layer_forward(x, weight, gamma, beta, *, stride, padding):
    """x: [N, C_in, H, W] (NCHW, like PyTorch); weight: [C_out, C_in, KH, KW]."""
    N, C_in, H, W = x.shape
    C_out, C_in_w, KH, KW = weight.shape
    assert C_in == C_in_w  # TODO(synk): grouped conv (groups > 1) not implemented
    H_out = (H + 2 * padding - KH) // stride + 1
    W_out = (W + 2 * padding - KW) // stride + 1
    M = N * H_out * W_out
    CKK = C_in * KH * KW

    # ---- im2col in NHWC order (channels fastest => lane axis), plain-JAX glue ----
    xp = jnp.pad(x.astype(jnp.bfloat16),
                 ((0, 0), (0, 0), (padding, padding), (padding, padding)))
    xnhwc = jnp.transpose(xp, (0, 2, 3, 1))                      # [N, Hp, Wp, C_in]
    cols = []
    for i in range(KH):
        for j in range(KW):
            cols.append(
                xnhwc[:, i:i + (H_out - 1) * stride + 1:stride,
                          j:j + (W_out - 1) * stride + 1:stride, :]
            )
    patches = jnp.concatenate(cols, axis=-1).reshape(M, CKK)      # [M, KH*KW*C_in], bf16

    # matching weight layout: [KH, KW, C_in, C_out] -> [CKK, C_out]
    w_mat = jnp.transpose(weight, (2, 3, 1, 0)).reshape(CKK, C_out).astype(jnp.bfloat16)

    # ---- lane / MXU friendly padded sizes ----
    C_out_p = _round_up(C_out, 128)
    CKK_p = _round_up(CKK, 128)
    TILE_K = _pick_tile_k(CKK_p)
    num_k = CKK_p // TILE_K

    vmem_limit = _vmem_limit_bytes()
    # TILE_M: multiple of 256 (bf16 sublane=16, 256x256 MXU), >= 2 tiles when possible
    # so the "parallel" M axis can load-balance across v7x's two TensorCores.
    TILE_M = min(1024, max(256, _round_up(pl.cdiv(M, 2), 256)))

    def _vmem_est(tm, tk):
        return (2 * tm * tk * 2            # patches, double-buffered bf16
                + 2 * tk * C_out_p * 2     # weights, double-buffered bf16
                + tm * C_out_p * 4         # f32 accumulator scratch
                + 2 * tm * C_out_p * 4)    # f32 output, double-buffered

    while TILE_M > 256 and _vmem_est(TILE_M, TILE_K) > (vmem_limit * 3) // 4:
        TILE_M //= 2

    M_p = _round_up(M, TILE_M)
    num_tiles = M_p // TILE_M

    # Single jnp.pad per operand (no zeros + .at[].set double materialization).
    # NOTE: padded rows of patches_p MUST stay zero — BN stats rely on it.
    patches_p = jnp.pad(patches, ((0, M_p - M), (0, CKK_p - CKK)))
    w_p = jnp.pad(w_mat, ((0, CKK_p - CKK), (0, C_out_p - C_out)))
    gamma_p = jnp.pad(gamma.astype(jnp.float32), (0, C_out_p - C_out))
    beta_p = jnp.pad(beta.astype(jnp.float32), (0, C_out_p - C_out))

    cparams_2d = pltpu.CompilerParams(
        dimension_semantics=("parallel", "arbitrary"),
        vmem_limit_bytes=vmem_limit,
    )
    cparams_1d = pltpu.CompilerParams(
        dimension_semantics=("parallel",),
        vmem_limit_bytes=vmem_limit,
    )

    p_spec = pl.BlockSpec((TILE_M, TILE_K), lambda i, k: (i, k))
    w_spec = pl.BlockSpec((TILE_K, C_out_p), lambda i, k: (k, 0))
    stats_spec = pl.BlockSpec((1, 2, C_out_p), lambda i, k: (i, 0, 0))
    acc_scratch = pltpu.VMEM((TILE_M, C_out_p), jnp.float32)

    # Re-reading the bf16 patches in pass 2 is cheaper than round-tripping even a
    # bf16 conv intermediate whenever the per-row patch width <= twice the
    # (padded) output width.
    use_recompute = CKK_p <= 2 * C_out_p

    # ---- pass 1 ----
    if use_recompute:
        stats = pl.pallas_call(
            _stats_only_kernel,
            out_shape=jax.ShapeDtypeStruct((num_tiles, 2, C_out_p), jnp.float32),
            grid=(num_tiles, num_k),
            in_specs=[p_spec, w_spec],
            out_specs=stats_spec,
            scratch_shapes=[acc_scratch],
            compiler_params=cparams_2d,
        )(patches_p, w_p)
        conv_bf16 = None
    else:
        conv_bf16, stats = pl.pallas_call(
            _conv_stats_kernel,
            out_shape=(
                jax.ShapeDtypeStruct((M_p, C_out_p), jnp.bfloat16),
                jax.ShapeDtypeStruct((num_tiles, 2, C_out_p), jnp.float32),
            ),
            grid=(num_tiles, num_k),
            in_specs=[p_spec, w_spec],
            out_specs=(
                pl.BlockSpec((TILE_M, C_out_p), lambda i, k: (i, 0)),
                stats_spec,
            ),
            scratch_shapes=[acc_scratch],
            compiler_params=cparams_2d,
        )(patches_p, w_p)

    # ---- BN finalize hoisted out of the per-tile loop (tiny plain-JAX op) ----
    stats_sum = jnp.sum(stats, axis=0)                 # [2, C_out_p]
    mean = stats_sum[0] * (1.0 / M)                    # padded rows contribute exactly 0
    var = jnp.maximum(stats_sum[1] * (1.0 / M) - mean * mean, 0.0)  # clamp (rsqrt safety)
    inv_std = jax.lax.rsqrt(var + BN_EPS)
    scale = (gamma_p * inv_std).reshape(1, C_out_p)
    shift = (beta_p - mean * gamma_p * inv_std).reshape(1, C_out_p)

    # ---- pass 2 ----
    if use_recompute:
        out = pl.pallas_call(
            _fused_conv_bn_relu6_kernel,
            out_shape=jax.ShapeDtypeStruct((M_p, C_out_p), jnp.float32),
            grid=(num_tiles, num_k),
            in_specs=[
                p_spec,
                w_spec,
                pl.BlockSpec((1, C_out_p), lambda i, k: (0, 0)),   # resident scale
                pl.BlockSpec((1, C_out_p), lambda i, k: (0, 0)),   # resident shift
            ],
            out_specs=pl.BlockSpec((TILE_M, C_out_p), lambda i, k: (i, 0)),
            scratch_shapes=[acc_scratch],
            compiler_params=cparams_2d,
        )(patches_p, w_p, scale, shift)
    else:
        out = pl.pallas_call(
            _bn_relu6_kernel,
            out_shape=jax.ShapeDtypeStruct((M_p, C_out_p), jnp.float32),
            grid=(num_tiles,),
            in_specs=[
                pl.BlockSpec((TILE_M, C_out_p), lambda i: (i, 0)),
                pl.BlockSpec((1, C_out_p), lambda i: (0, 0)),
                pl.BlockSpec((1, C_out_p), lambda i: (0, 0)),
            ],
            out_specs=pl.BlockSpec((TILE_M, C_out_p), lambda i: (i, 0)),
            compiler_params=cparams_1d,
        )(conv_bf16, scale, shift)

    # strip padding, back to NCHW (f32, matching the PyTorch module output)
    out = out[:M, :C_out].reshape(N, H_out, W_out, C_out)
    return jnp.transpose(out, (0, 3, 1, 2))


if __name__ == "__main__":
    # ConvLayer(in_channel=4, out_channel=8, kernel_size=3, stride=1, padding=1)
    N, C_in, H, W = 2, 4, 16, 16
    C_out, K, stride, padding = 8, 3, 1, 1

    key = jax.random.PRNGKey(0)
    kx, kw = jax.random.split(key)
    x = jax.random.normal(kx, (N, C_in, H, W), dtype=jnp.float32)
    weight = jax.random.normal(kw, (C_out, C_in, K, K), dtype=jnp.float32) * 0.1
    # BatchNorm2d default affine init: weight=1, bias=0.
    gamma = jnp.ones((C_out,), dtype=jnp.float32)
    beta = jnp.zeros((C_out,), dtype=jnp.float32)

    y = conv_layer_forward(x, weight, gamma, beta, stride=stride, padding=padding)
    y = jax.block_until_ready(y)

    # Reference (pure JAX): conv with the same bf16 input rounding + f32 accumulation,
    # then batch-stats BN and ReLU6.
    conv_ref = jax.lax.conv_general_dilated(
        x.astype(jnp.bfloat16), weight.astype(jnp.bfloat16),
        (stride, stride), [(padding, padding), (padding, padding)],
        dimension_numbers=("NCHW", "OIHW", "NCHW"),
        preferred_element_type=jnp.float32)
    mean = conv_ref.mean(axis=(0, 2, 3), keepdims=True)
    var = conv_ref.var(axis=(0, 2, 3), keepdims=True)
    ref = (conv_ref - mean) / jnp.sqrt(var + BN_EPS)
    ref = ref * gamma.reshape(1, -1, 1, 1) + beta.reshape(1, -1, 1, 1)
    ref = jnp.clip(ref, 0.0, 6.0)

    assert y.shape == (N, C_out, H, W)
    max_err = float(jnp.max(jnp.abs(y - ref)))
    assert max_err < 2e-2, max_err
    print("KERNEL_OK")
</pallas_src>

<mosaic_0001>
module attributes {stable_mosaic.version = 11 : i64} {
  func.func @_stats_only_kernel(%arg0: i32, %arg1: i32, %arg2: memref<256x128xbf16, #tpu.memory_space<vmem>>, %arg3: memref<128x128xbf16, #tpu.memory_space<vmem>>, %arg4: memref<1x2x128xf32, #tpu.memory_space<vmem>>, %arg5: memref<256x128xf32, #tpu.memory_space<vmem>>) attributes {dimension_semantics = [#tpu.dimension_semantics<parallel>, #tpu.dimension_semantics<arbitrary>], iteration_bounds = array<i64: 2, 1>, scalar_prefetch = 0 : i64, scratch_operands = 1 : i64, tpu.core_type = #tpu.core_type<tc>, window_params = [{transform_indices = @transform_0, window_bounds = array<i64: 256, 128>}, {transform_indices = @transform_1, window_bounds = array<i64: 128, 128>}, {transform_indices = @transform_2, window_bounds = array<i64: 1, 2, 128>}]} {
    %c0_i32 = arith.constant 0 : i32
    %0 = arith.cmpi eq, %arg1, %c0_i32 : i32
    %1 = arith.extui %0 : i1 to i32
    %c0_i32_0 = arith.constant 0 : i32
    %2 = arith.cmpi ne, %1, %c0_i32_0 : i32
    scf.if %2 {
      %cst_10 = arith.constant 0.000000e+00 : f32
      %12 = vector.broadcast %cst_10 : f32 to vector<256x128xf32>
      %c0_11 = arith.constant 0 : index
      %c0_12 = arith.constant 0 : index
      %13 = vector.load %arg5[%c0_11, %c0_12] : memref<256x128xf32, #tpu.memory_space<vmem>>, vector<256x128xf32>
      tpu.vector_store %arg5[%c0_11, %c0_12], %12 {strides = array<i32>} : memref<256x128xf32, #tpu.memory_space<vmem>>, vector<256x128xf32>,
    } else {
    }
    %c0 = arith.constant 0 : index
    %c0_1 = arith.constant 0 : index
    %3 = vector.load %arg5[%c0, %c0_1] : memref<256x128xf32, #tpu.memory_space<vmem>>, vector<256x128xf32>
    %c0_2 = arith.constant 0 : index
    %c0_3 = arith.constant 0 : index
    %4 = vector.load %arg2[%c0_2, %c0_3] : memref<256x128xbf16, #tpu.memory_space<vmem>>, vector<256x128xbf16>
    %c0_4 = arith.constant 0 : index
    %c0_5 = arith.constant 0 : index
    %5 = vector.load %arg3[%c0_4, %c0_5] : memref<128x128xbf16, #tpu.memory_space<vmem>>, vector<128x128xbf16>
    %cst = arith.constant dense<0.000000e+00> : vector<256x128xf32>
    %6 = tpu.matmul %4, %5, %cst {dimension_numbers = #tpu.dot_dimension_numbers<[1], [0], [0], [1], [0, 0, 1, 1], [], []>} : vector<256x128xbf16>, vector<128x128xbf16>, vector<256x128xf32> -> vector<256x128xf32>
    %7 = arith.addf %3, %6 : vector<256x128xf32>
    %c0_6 = arith.constant 0 : index
    %c0_7 = arith.constant 0 : index
    %8 = vector.load %arg5[%c0_6, %c0_7] : memref<256x128xf32, #tpu.memory_space<vmem>>, vector<256x128xf32>
    tpu.vector_store %arg5[%c0_6, %c0_7], %7 {strides = array<i32>} : memref<256x128xf32, #tpu.memory_space<vmem>>, vector<256x128xf32>,
    %c0_i32_8 = arith.constant 0 : i32
    %9 = arith.cmpi eq, %arg1, %c0_i32_8 : i32
    %10 = arith.extui %9 : i1 to i32
    %c0_i32_9 = arith.constant 0 : i32
    %11 = arith.cmpi ne, %10, %c0_i32_9 : i32
    scf.if %11 {
      %c0_10 = arith.constant 0 : index
      %c0_11 = arith.constant 0 : index
      %12 = vector.load %arg5[%c0_10, %c0_11] : memref<256x128xf32, #tpu.memory_space<vmem>>, vector<256x128xf32>
      %cst_12 = arith.constant dense<0.000000e+00> : vector<128xf32>
      %13 = vector.multi_reduction <add>, %12, %cst_12 [0] : vector<256x128xf32> to vector<128xf32>
      %14 = vector.shape_cast %13 : vector<128xf32> to vector<1x128xf32>
      %15 = arith.mulf %12, %12 : vector<256x128xf32>
      %cst_13 = arith.constant dense<0.000000e+00> : vector<128xf32>
      %16 = vector.multi_reduction <add>, %15, %cst_13 [0] : vector<256x128xf32> to vector<128xf32>
      %17 = vector.shape_cast %16 : vector<128xf32> to vector<1x128xf32>
      %18 = tpu.concatenate %14, %17 in 0 : vector<1x128xf32>, vector<1x128xf32> -> vector<2x128xf32>
      %19 = vector.shape_cast %18 : vector<2x128xf32> to vector<1x2x128xf32>
      %c0_14 = arith.constant 0 : index
      %c0_15 = arith.constant 0 : index
      %c0_16 = arith.constant 0 : index
      %20 = vector.load %arg4[%c0_14, %c0_15, %c0_16] : memref<1x2x128xf32, #tpu.memory_space<vmem>>, vector<1x2x128xf32>
      tpu.vector_store %arg4[%c0_14, %c0_15, %c0_16], %19 {strides = array<i32>} : memref<1x2x128xf32, #tpu.memory_space<vmem>>, vector<1x2x128xf32>,
    } else {
    }
    return
  }
  func.func @transform_0(%arg0: i32, %arg1: i32) -> (i32, i32) {
    %c0_i32 = arith.constant 0 : i32
    return %arg0, %arg1 : i32, i32
  }
  func.func @transform_1(%arg0: i32, %arg1: i32) -> (i32, i32) {
    %c0_i32 = arith.constant 0 : i32
    %c0_i32_0 = arith.constant 0 : i32
    return %arg1, %c0_i32 : i32, i32
  }
  func.func @transform_2(%arg0: i32, %arg1: i32) -> (i32, i32, i32) {
    %c0_i32 = arith.constant 0 : i32
    %c0_i32_0 = arith.constant 0 : i32
    %c0_i32_1 = arith.constant 0 : i32
    return %arg0, %c0_i32, %c0_i32_0 : i32, i32, i32
  }
}

</mosaic_0001>

<bundles_post_ra>
// kernel: tpu_custom_call.1
= control target key start
LH: loop header
LB: loop body
LE: loop exit
PB: predicated region body
PF: predicated region fallthrough
CT: control target
= control target key end

     0   :  { %7 = vsyncpa [#allocation4], 0  ;;  %s1624_s0 = inlined_call_operand.hbm [shape: bf16[512,128], index: 0, kind: input, shape index: {}]   ;;  %s1625_s1 = inlined_call_operand.hbm [shape: bf16[128,128], index: 1, kind: input, shape index: {}]   ;;  %s1626_s2 = inlined_call_operand.hbm [shape: f32[2,2,128], index: 2, kind: output, shape index: {}]  }
   0x1   :  { %9 = vsyncpa [#allocation4 + $0x1], 0 }
   0x2   :  { %10 = vsyncpa [#allocation7], 0 }
   0x3   :  { %11 = vsyncpa [#allocation5], 0 }
   0x4   :  { %13 = vsyncpa [#allocation5 + $0x1], 0  ;;  %s1332_s9 = smov 0   ;;  %s1334_s10 = smov 0  }
   0x5   :  { %s1336_s11 = smov 0   ;;  %s1338_s12 = smov 0  }
   0x6   :  { %s1340_s13 = smov 0   ;;  %s1342_s14 = smov 0  }
   0x7 LB: > { %s938_s15 = sadd.s32 4294967295, %s1310_s14   ;;  %s939_s16 = sadd.s32 4294967294, %s1310_s14   ;;  %s1310_s14 = sphi %s1342_s14, %s19_s14   ;;  %s1306_s13 = sphi %s1340_s13, %s1650_s13   ;;  %s1302_s12 = sphi %s1338_s12, %s1649_s12   ;;  %s1298_s11 = sphi %s1336_s11, %s1648_s11   ;;  %s1294_s10 = sphi %s1334_s10, %s1647_s10   ;;  %s1290_s9 = sphi %s1332_s9, %s1646_s9  }
   0x8   : > { %p53_p0 = scmp.ne.s32.totalorder %s1294_s10, %s1290_s9  ;;  %p1366_p1 = scmp.eq.s32.totalorder %s938_s15, 0 }
   0x9   : > { %p1370_p2 = scmp.eq.s32.totalorder %s938_s15, 1  ;;  %p109_p3 = scmp.eq.s32.totalorder %s939_s16, 1 }
   0xa   : > { %s1631_s17 = scalar_select %p1366_p1, 1, 0 }
   0xb   : > { %s1632_s18 = scalar_select %p1370_p2, 1, 0 }
   0xc   : > { %p1376_p4 = por %p1366_p1, %p53_p0  ;;  %p940_p5 = scmp.ge.s32.totalorder %s1310_s14, 1 }
   0xd   : > { %p1381_p6 = por %p109_p3, %p53_p0  ;;  %p116_p7 = scmp.lt.s32.totalorder %s1310_s14, 3 }
   0xe   : > { %s1633_s19 = scalar_select %p1376_p4, 1, 0 }
   0xf   : > { %s1634_s20 = scalar_select %p1381_p6, 1, 0 }
  0x10   : > { %p1386_p8 = pnand %p940_p5, %p116_p7  ;;  %s1312_s22 = smov [#allocation6]  }
  0x11   : > { %s131_s23 = sshll.u32 %s1312_s22, 4  ;;  %s31_s25 = sadd.s32 1, %s1306_s13  ;;  %s132_s23 = int_to_ptr.vmem [resolvable:$true] %s131_s23 }
  0x12   : > { %s1635_s21 = scalar_select %p1386_p8, 1, 0 }
  0x13   : > { %p1075_p9 = pneg %p1386_p8  ;;  %s1166_s28 = scalar_lea.hbm %s1625_s1, 1024 }
  0x14   : > { %p1167_p12 = scmp.ne.s32.totalorder %s1625_s1, %s1166_s28  ;;  %p1173_p5 = scmp.lt.u32.totalorder %s1166_s28, %s1625_s1 }
  0x15   : > { %p1395_p11 = pnand %p1075_p9, %p1366_p1 }
  0x17   : > { %p1168_p13 = pneg %p1395_p11 }
  0x19   : > { %p1169_p0 = pnand %p1168_p13, %p1167_p12 }
  0x1b   : > { %p1170_p3 = pneg %p1169_p0 }
  0x1d   : > { %p1175_p7 = pnand %p1173_p5, %p1170_p3 }
  0x1f   : > { %1178 = shalt.err (!%p1175_p7)
}
  0x20   : > { %s1179_s5 = scalar_lea.vmem %s132_s23, 1024  ;;  %p1187_p1 = scmp.lt.s32.totalorder %s132_s23, %s132_s23 }
  0x21   : > { %p1180_p9 = scmp.ne.s32.totalorder %s132_s23, %s1179_s5  ;;  %p1188_p4 = scmp.lt.s32.totalorder %s1179_s5, %s1179_s5 }
  0x23   : > { %p1182_p10 = pnand %p1180_p9, %p1168_p13  ;;  %p1189_p8 = por %p1188_p4, %p1187_p1 }
  0x25   : > { %p1183_p6 = pneg %p1182_p10 }
  0x27   : > { %p1190_p2 = pnand %p1189_p8, %p1183_p6 }
  0x29   : > { %1193 = shalt.err (!%p1190_p2)
}
  0x2a   : > { %s1313_s6 = smov 64   ;;  %s1314_s7 = smov 4  }
  0x2b   : > { %1078 = dma.hbm_to_vmem [thread:$0]  (!%p1395_p11), %s1625_s1, 1024, %s132_s23, [#allocation7], %s1313_s6, %s1313_s6, %s1314_s7  }
  0x2c   : > { %p33_p1 = scmp.ge.s32.totalorder %s31_s25, 2  ;;  %s40_s16 = sadd.s32 1, %s1298_s11 }
  0x2d   : > { %p47_p2 = scmp.ne.s32.totalorder %s1298_s11, %s1294_s10  ;;  %p48_p4 = scmp.eq.s32.totalorder %s1310_s14, 0 }
  0x2e   : > { %s1652_s25 = smov (%p33_p1, %s31_s25), 0  ;;  %p1638_p8 = scmp.ne.s32.totalorder %s1632_s18, 0 }
  0x2f   : > { %p1425_p6 = por %p48_p4, %p47_p2  ;;  %s35_s26 = ssub.s32 %s1306_s13, %s1652_s25 }
  0x30   : > { %p1431_p10 = por %p1638_p8, %p47_p2  ;;  %p1088_p12 = scmp.lt.s32.totalorder %s1310_s14, 2 }
  0x31   : > { %p38_p11 = scmp.eq.s32.totalorder %s35_s26, 0  ;;  %s145_s23 = sand.u32 1, %s1298_s11  }
  0x32   : > { %s943_s27 = sshll.u32 %s145_s23, 7  ;;  %s978_s29 = sshll.u32 %s1306_s13, 11 }
  0x33   : > { %s1440_s28 = scalar_select %p38_p11, %s1298_s11, %s40_s16  }
  0x34   : > { %s1446_s4 = scalar_lea.hbm %s1624_s0, %s978_s29  ;;  %s149_s18 = scalar_lea.vmem [#allocation3], %s943_s27 }
  0x35   : > { %s157_s5 = sshll.u32 %s149_s18, 4  ;;  %p1452_p13 = pnand %p1088_p12, %p1425_p6  ;;  %s1448_s5 = int_to_ptr.vmem [resolvable:$true] %s157_s5 }
  0x36   : > { %s1456_s15 = scalar_lea.sflag [#allocation4], %s145_s23  ;;  %s1194_s16 = scalar_lea.hbm %s1446_s4, 2048 }
  0x37   : > { %p1195_p0 = scmp.ne.s32.totalorder %s1446_s4, %s1194_s16  ;;  %p1196_p3 = pneg %p1452_p13 }
  0x38   : > { %s1199_s22 = scalar_lea.hbm %s1624_s0, 4096  ;;  %p1200_p9 = scmp.lt.u32.totalorder %s1446_s4, %s1624_s0 }
  0x39   : > { %p1197_p5 = pnand %p1196_p3, %p1195_p0  ;;  %p1201_p1 = scmp.lt.u32.totalorder %s1199_s22, %s1194_s16 }
  0x3a   : > { %p1203_p4 = scmp.lt.u32.totalorder %s1194_s16, %s1446_s4 }
  0x3b   : > { %p1198_p7 = pneg %p1197_p5  ;;  %p1202_p2 = por %p1201_p1, %p1200_p9 }
  0x3d   : > { %p1204_p6 = por %p1203_p4, %p1202_p2 }
  0x3f   : > { %p1205_p8 = pnand %p1204_p6, %p1198_p7 }
  0x41   : > { %1208 = shalt.err (!%p1205_p8)
}
  0x42   : > { %s1209_s23 = scalar_lea.vmem %s1448_s5, 2048  ;;  %s1315_s3 = smov [#allocation3]  }
  0x43   : > { %p1210_p12 = scmp.ne.s32.totalorder %s1448_s5, %s1209_s23  ;;  %s1214_s18 = sshll.u32 %s1315_s3, 4  ;;  %s1215_s18 = int_to_ptr.vmem [resolvable:$false] %s1214_s18 }
  0x44   : > { %s1216_s26 = scalar_lea.vmem %s1215_s18, 4096  ;;  %p1217_p5 = scmp.lt.s32.totalorder %s1448_s5, %s1215_s18 }
  0x45   : > { %p1212_p11 = pnand %p1210_p12, %p1196_p3  ;;  %p1218_p9 = scmp.lt.s32.totalorder %s1216_s26, %s1209_s23 }
  0x47   : > { %p1213_p0 = pneg %p1212_p11  ;;  %p1219_p1 = por %p1218_p9, %p1217_p5 }
  0x49   : > { %p1220_p2 = pnand %p1219_p1, %p1213_p0 }
  0x4b   : > { %1223 = shalt.err (!%p1220_p2)
}
  0x4c   : > { %1082 = dma.hbm_to_vmem [thread:$0]  (!%p1452_p13), %s1446_s4, 2048, %s1448_s5, %s1456_s15, %s1313_s6, %s1313_s6, %s1314_s7  }
  0x4d   : > { %p1641_p3 = scmp.ne.s32.totalorder %s1635_s21, 0 }
  0x4e   : > { %s1490_s16 = sand.u32 (!%p1641_p3), 1, %s1294_s10   ;;  %p1642_p7 = scmp.ne.s32.totalorder (!%p1641_p3), %s1633_s19, 0 }
  0x4f   : > { %169 = sbr.rel (%p1641_p3) target bundleno = 429 (0x1ad), region = 28  ;;  %s947_s27 = sshll.u32 (!%p1641_p3), %s1490_s16, 7 }
  0x50   : > { %s172_s22 = scalar_lea.sflag (!%p1641_p3), [#allocation4], %s1490_s16  ;;  %s1494_s29 = scalar_lea.vmem (!%p1641_p3), [#allocation3], %s947_s27 }
  0x56   : > { %1277 = dma.done.wait (%p1642_p7), %s172_s22, 2048  }
  0x57   : > { %1279 = vsyncadd (%p1642_p7), %s172_s22, 4294965248  ;;  %p1643_p13 = scmp.ne.s32.totalorder %s1631_s17, 0 }
  0x59   : > { %1281 = dma.done.wait (%p1643_p13), [#allocation7], 1024  }
  0x5a   : > { %1283 = vsyncadd (%p1643_p13), [#allocation7], 4294966272  ;;  %v1142_v0 = vld [vmem:[#allocation6] sm:$0xff]   ;;  %v1143_v1 = vld [vmem:[#allocation6 + $0x8] sm:$0xff]   ;;  %s949_s17 = sshll.u32 %s1490_s16, 1  ;;  %s975_s19 = sshll.u32 %s1302_s12, 5 }
  0x5b   : > { %1003 = vmatprep.subr.bf16.mxu0 %v1142_v0  ;;  %1051 = vmatprep.subr.bf16.mxu1 %v1142_v0  ;;  %v1144_v2 = vld [vmem:[#allocation6 + $0x10] sm:$0xff]   ;;  %v1145_v3 = vld [vmem:[#allocation6 + $0x18] sm:$0xff]   ;;  %v1150_v4 = vld [vmem:[%s1494_s29] sm:$0xff]   ;;  %s199_s21 = scalar_lea.vmem [#allocation8], %s949_s17  ;;  %vm829_vm0 = vcmask 1040384   ;;  %s1575_s5 = scalar_lea.hbm %s1626_s2, %s975_s19 }
  0x5c   : > { %1004 = vmatpush3.bf16.msra.mxu0 %v1142_v0  ;;  %1059 = vmatpush3.bf16.msra.mxu1 %v1142_v0  ;;  %v1146_v5 = vld [vmem:[#allocation6 + $0x20] sm:$0xff]   ;;  %v1147_v6 = vld [vmem:[#allocation6 + $0x28] sm:$0xff]   ;;  %v1148_v8 = vld [vmem:[#allocation6 + $0x30] sm:$0xff]   ;;  %s846_s6 = sshll.u32 %s199_s21, 4  ;;  %s833_s8 = scalar_lea.sflag [#allocation5], %s1490_s16  ;;  %s1577_s6 = int_to_ptr.vmem [resolvable:$true] %s846_s6 }
  0x5d   : > { %1005 = vmatprep.subr.bf16.mxu0 %v1143_v1  ;;  %1052 = vmatprep.subr.bf16.mxu1 %v1143_v1  ;;  %v1158_v7 = vld [vmem:[%s1494_s29 + $0x40] sm:$0xff]   ;;  %v1149_v9 = vld [vmem:[#allocation6 + $0x38] sm:$0xff]   ;;  %v1151_v10 = vld [vmem:[%s1494_s29 + $0x8] sm:$0xff]   ;;  %s1224_s15 = scalar_lea.vmem %s1577_s6, 32  ;;  %s1316_s12 = smov [#allocation8]  }
  0x5e   : > { %1019 = vmatprep.mubr.bf16.mxu0 %v1150_v4  ;;  %1035 = vmatprep.mubr.bf16.mxu1 %v1158_v7  ;;  %v1159_v11 = vld [vmem:[%s1494_s29 + $0x48] sm:$0xff]   ;;  %v1152_v12 = vld [vmem:[%s1494_s29 + $0x10] sm:$0xff]   ;;  %v1153_v14 = vld [vmem:[%s1494_s29 + $0x18] sm:$0xff]   ;;  %p1225_p4 = scmp.ne.s32.totalorder %s1577_s6, %s1224_s15  ;;  %s1228_s30 = sshll.u32 %s1316_s12, 4  ;;  %s1229_s30 = int_to_ptr.vmem [resolvable:$false] %s1228_s30 }
  0x5f   : > { %v1160_v13 = vld [vmem:[%s1494_s29 + $0x50] sm:$0xff]   ;;  %v1161_v15 = vld [vmem:[%s1494_s29 + $0x58] sm:$0xff]   ;;  %v1154_v16 = vld [vmem:[%s1494_s29 + $0x20] sm:$0xff]   ;;  %s1230_s23 = scalar_lea.vmem %s1229_s30, 64  ;;  %p1231_p12 = scmp.lt.s32.totalorder %s1577_s6, %s1229_s30 }
  0x60   : > { %1006 = vmatpush3.bf16.msra.mxu0 %v1143_v1  ;;  %1060 = vmatpush3.bf16.msra.mxu1 %v1143_v1  ;;  %v1162_v17 = vld [vmem:[%s1494_s29 + $0x60] sm:$0xff]   ;;  %v1155_v18 = vld [vmem:[%s1494_s29 + $0x28] sm:$0xff]   ;;  %v1156_v20 = vld [vmem:[%s1494_s29 + $0x30] sm:$0xff]   ;;  %p1226_p6 = pnand %p1225_p4, %p1431_p10  ;;  %p1232_p11 = scmp.lt.s32.totalorder %s1230_s23, %s1224_s15 }
  0x61   : > { %1007 = vmatprep.subr.bf16.mxu0 %v1144_v2  ;;  %1053 = vmatprep.subr.bf16.mxu1 %v1144_v2  ;;  %v1163_v19 = vld [vmem:[%s1494_s29 + $0x68] sm:$0xff]   ;;  %v1164_v21 = vld [vmem:[%s1494_s29 + $0x70] sm:$0xff]   ;;  %v1157_v22 = vld [vmem:[%s1494_s29 + $0x38] sm:$0xff]  }
  0x62   : > { %v1165_v23 = vld [vmem:[%s1494_s29 + $0x78] sm:$0xff]   ;;  %p1227_p8 = pneg %p1226_p6  ;;  %p1233_p0 = por %p1232_p11, %p1231_p12 }
  0x64   : > { %1008 = vmatpush3.bf16.msra.mxu0 %v1144_v2  ;;  %1061 = vmatpush3.bf16.msra.mxu1 %v1144_v2  ;;  %p1234_p5 = pnand %p1233_p0, %p1227_p8 }
  0x65   : > { %1009 = vmatprep.subr.bf16.mxu0 %v1145_v3  ;;  %1054 = vmatprep.subr.bf16.mxu1 %v1145_v3 }
  0x68   : > { %1010 = vmatpush3.bf16.msra.mxu0 %v1145_v3  ;;  %1062 = vmatpush3.bf16.msra.mxu1 %v1145_v3 }
  0x69   : > { %1011 = vmatprep.subr.bf16.mxu0 %v1146_v5  ;;  %1055 = vmatprep.subr.bf16.mxu1 %v1146_v5 }
  0x6c   : > { %1012 = vmatpush3.bf16.msra.mxu0 %v1146_v5  ;;  %1063 = vmatpush3.bf16.msra.mxu1 %v1146_v5 }
  0x6d   : > { %1013 = vmatprep.subr.bf16.mxu0 %v1147_v6  ;;  %1056 = vmatprep.subr.bf16.mxu1 %v1147_v6 }
  0x70   : > { %1014 = vmatpush3.bf16.msra.mxu0 %v1147_v6  ;;  %1064 = vmatpush3.bf16.msra.mxu1 %v1147_v6 }
  0x71   : > { %1015 = vmatprep.subr.bf16.mxu0 %v1148_v8  ;;  %1057 = vmatprep.subr.bf16.mxu1 %v1148_v8 }
  0x74   : > { %1016 = vmatpush3.bf16.msra.mxu0 %v1148_v8  ;;  %1065 = vmatpush3.bf16.msra.mxu1 %v1148_v8 }
  0x75   : > { %1017 = vmatprep.subr.bf16.mxu0 %v1149_v9  ;;  %1058 = vmatprep.subr.bf16.mxu1 %v1149_v9 }
  0x78   : > { %1018 = vmatpush3.bf16.msra.mxu0 %v1149_v9  ;;  %1066 = vmatpush3.bf16.msra.mxu1 %v1149_v9 }
  0x7b   : > { %1020 = vmatmul.mubr.bf16.vlgmr.msra.gmra.mrb[0].mxu0 %v1151_v10  ;;  %1036 = vmatmul.mubr.bf16.vlgmr.msra.gmra.mrb[0].mxu1 %v1159_v11 }
  0x7c   : > { %1023 = vmatprep.mubr.bf16.mxu0 %v1152_v12  ;;  %1039 = vmatprep.mubr.bf16.mxu1 %v1160_v13 }
  0x83   : > { %1024 = vmatmul.mubr.bf16.gmra.mrb[4].mxu0 %v1153_v14  ;;  %1040 = vmatmul.mubr.bf16.gmra.mrb[4].mxu1 %v1161_v15 }
  0x84   : > { %1027 = vmatprep.mubr.bf16.mxu0 %v1154_v16  ;;  %1043 = vmatprep.mubr.bf16.mxu1 %v1162_v17 }
  0x8b   : > { %1028 = vmatmul.mubr.bf16.gmra.mrb[8].mxu0 %v1155_v18  ;;  %1044 = vmatmul.mubr.bf16.gmra.mrb[8].mxu1 %v1163_v19 }
  0x8c   : > { %1031 = vmatprep.mubr.bf16.mxu0 %v1156_v20  ;;  %1047 = vmatprep.mubr.bf16.mxu1 %v1164_v21 }
  0x93   : > { %1032 = vmatmul.mubr.bf16.gmra.mrb[12].mxu0 %v1157_v22  ;;  %1048 = vmatmul.mubr.bf16.gmra.mrb[12].mxu1 %v1165_v23 }
 0x14e   : > { %v1021_v24 = vpop.f32.mrb[0].mxu0  ;;  %v1520_v25 = vpop.f32.mrb[0].mxu1 }
 0x14f   : > { %v497_v26 = vpop.f32.mrb[1].mxu0  ;;  %v1522_v27 = vpop.f32.mrb[1].mxu1  ;;  %v762_v35 = vmul.f32 %v1021_v24, %v1021_v24 }
 0x150   : > { %v1022_v28 = vpop.f32.mrb[2].mxu0  ;;  %v1524_v29 = vpop.f32.mrb[2].mxu1  ;;  %v760_v32 = vmul.f32 %v497_v26, %v497_v26 }
 0x151   : > { %v500_v30 = vpop.f32.mrb[3].mxu0  ;;  %v1526_v31 = vpop.f32.mrb[3].mxu1  ;;  %v763_v38 = vmul.f32 %v1022_v28, %v1022_v28 }
 0x152   : > { %v723_v33 = vadd.f32 %v500_v30, %v497_v26  ;;  %v761_v34 = vmul.f32 %v500_v30, %v500_v30 }
 0x154   : > { %v724_v36 = vadd.f32 %v1021_v24, %v723_v33  ;;  %v792_v37 = vadd.f32 %v761_v34, %v760_v32 }
 0x156   : > { %v793_v39 = vadd.f32 %v792_v37, %v762_v35  ;;  %v1025_v40 = vpop.f32.mrb[4].mxu0  ;;  %v725_v41 = vadd.f32 %v1022_v28, %v724_v36  ;;  %v1528_v42 = vpop.f32.mrb[4].mxu1 }
 0x157   : > { %v513_v43 = vpop.f32.mrb[5].mxu0  ;;  %v1530_v44 = vpop.f32.mrb[5].mxu1  ;;  %v766_v55 = vmul.f32 %v1025_v40, %v1025_v40 }
 0x158   : > { %v726_v45 = vadd.f32 %v725_v41, %v513_v43  ;;  %v764_v46 = vmul.f32 %v513_v43, %v513_v43  ;;  %v794_v47 = vadd.f32 %v793_v39, %v763_v38  ;;  %v1026_v48 = vpop.f32.mrb[6].mxu0  ;;  %v1532_v49 = vpop.f32.mrb[6].mxu1  ;;  %v776_v41 = vmul.f32 %v1522_v27, %v1522_v27 }
 0x159   : > { %v516_v50 = vpop.f32.mrb[7].mxu0  ;;  %v1534_v51 = vpop.f32.mrb[7].mxu1  ;;  %v767_v58 = vmul.f32 %v1026_v48, %v1026_v48 }
 0x15a   : > { %v795_v52 = vadd.f32 %v794_v47, %v764_v46  ;;  %v727_v53 = vadd.f32 %v726_v45, %v516_v50  ;;  %v765_v54 = vmul.f32 %v516_v50, %v516_v50  ;;  %v778_v50 = vmul.f32 %v1520_v25, %v1520_v25 }
 0x15c   : > { %v728_v56 = vadd.f32 %v1025_v40, %v727_v53  ;;  %v796_v57 = vadd.f32 %v795_v52, %v765_v54  ;;  %v779_v54 = vmul.f32 %v1524_v29, %v1524_v29 }
 0x15e   : > { %v797_v59 = vadd.f32 %v796_v57, %v766_v55  ;;  %v1029_v60 = vpop.f32.mrb[8].mxu0  ;;  %v729_v61 = vadd.f32 %v1026_v48, %v728_v56  ;;  %v1536_v62 = vpop.f32.mrb[8].mxu1  ;;  %v777_v48 = vmul.f32 %v1526_v31, %v1526_v31 }
 0x15f   : > { %v529_v63 = vpop.f32.mrb[9].mxu0  ;;  %v593_v0 = vpop.f32.mrb[9].mxu1  ;;  %v770_v11 = vmul.f32 %v1029_v60, %v1029_v60 }
 0x160   : > { %v730_v1 = vadd.f32 %v729_v61, %v529_v63  ;;  %v768_v2 = vmul.f32 %v529_v63, %v529_v63  ;;  %v798_v3 = vadd.f32 %v797_v59, %v767_v58  ;;  %v1030_v4 = vpop.f32.mrb[10].mxu0  ;;  %v1538_v5 = vpop.f32.mrb[10].mxu1 }
 0x161   : > { %v532_v6 = vpop.f32.mrb[11].mxu0  ;;  %v596_v7 = vpop.f32.mrb[11].mxu1  ;;  %v771_v14 = vmul.f32 %v1030_v4, %v1030_v4 }
 0x162   : > { %v799_v8 = vadd.f32 %v798_v3, %v768_v2  ;;  %v731_v9 = vadd.f32 %v730_v1, %v532_v6  ;;  %v769_v10 = vmul.f32 %v532_v6, %v532_v6 }
 0x164   : > { %v732_v12 = vadd.f32 %v1029_v60, %v731_v9  ;;  %v800_v13 = vadd.f32 %v799_v8, %v769_v10  ;;  %v781_v60 = vmul.f32 %v1534_v51, %v1534_v51  ;;  %v785_v9 = vmul.f32 %v596_v7, %v596_v7 }
 0x166   : > { %v801_v15 = vadd.f32 %v800_v13, %v770_v11  ;;  %v1033_v16 = vpop.f32.mrb[12].mxu0  ;;  %v733_v17 = vadd.f32 %v1030_v4, %v732_v12  ;;  %v1049_v18 = vpop.f32.mrb[12].mxu1 }
 0x167   : > { %v545_v19 = vpop.f32.mrb[13].mxu0  ;;  %v609_v20 = vpop.f32.mrb[13].mxu1  ;;  %v774_v35 = vmul.f32 %v1033_v16, %v1033_v16 }
 0x168   : > { %v734_v21 = vadd.f32 %v733_v17, %v545_v19  ;;  %v772_v22 = vmul.f32 %v545_v19, %v545_v19  ;;  %v802_v23 = vadd.f32 %v801_v15, %v771_v14  ;;  %v1034_v24 = vpop.f32.mrb[14].mxu0  ;;  %v1050_v26 = vpop.f32.mrb[14].mxu1  ;;  %v788_v14 = vmul.f32 %v609_v20, %v609_v20 }
 0x169   : > { %v548_v28 = vpop.f32.mrb[15].mxu0  ;;  %v612_v30 = vpop.f32.mrb[15].mxu1  ;;  %v775_v38 = vmul.f32 %v1034_v24, %v1034_v24 }
 0x16a   : > { %v803_v32 = vadd.f32 %v802_v23, %v772_v22  ;;  %v735_v33 = vadd.f32 %v734_v21, %v548_v28  ;;  %v773_v34 = vmul.f32 %v548_v28, %v548_v28  ;;  %v789_v17 = vmul.f32 %v612_v30, %v612_v30 }
 0x16b   : > { %v791_v22 = vmul.f32 %v1050_v26, %v1050_v26 }
 0x16c   : > { %v736_v36 = vadd.f32 %v1033_v16, %v735_v33  ;;  %v804_v37 = vadd.f32 %v803_v32, %v773_v34 }
 0x16e   : > { %v805_v39 = vadd.f32 %v804_v37, %v774_v35  ;;  %v737_v40 = vadd.f32 %v1034_v24, %v736_v36 }
 0x170   : > { %v738_v43 = vadd.f32 %v737_v40, %v1522_v27  ;;  %v806_v45 = vadd.f32 %v805_v39, %v775_v38  ;;  %v780_v27 = vmul.f32 %v1530_v44, %v1530_v44 }
 0x172   : > { %v807_v46 = vadd.f32 %v806_v45, %v776_v41  ;;  %v739_v47 = vadd.f32 %v738_v43, %v1526_v31 }
 0x174   : > { %v740_v52 = vadd.f32 %v1520_v25, %v739_v47  ;;  %v808_v53 = vadd.f32 %v807_v46, %v777_v48  ;;  %v782_v25 = vmul.f32 %v1528_v42, %v1528_v42 }
 0x176   : > { %v809_v55 = vadd.f32 %v808_v53, %v778_v50  ;;  %v741_v56 = vadd.f32 %v1524_v29, %v740_v52  ;;  %v783_v29 = vmul.f32 %v1532_v49, %v1532_v49 }
 0x178   : > { %v742_v57 = vadd.f32 %v741_v56, %v1530_v44  ;;  %v810_v58 = vadd.f32 %v809_v55, %v779_v54  ;;  %v784_v44 = vmul.f32 %v593_v0, %v593_v0 }
 0x17a   : > { %v811_v59 = vadd.f32 %v810_v58, %v780_v27  ;;  %v743_v31 = vadd.f32 %v742_v57, %v1534_v51  ;;  %v786_v51 = vmul.f32 %v1536_v62, %v1536_v62 }
 0x17c   : > { %v744_v61 = vadd.f32 %v1528_v42, %v743_v31  ;;  %v812_v63 = vadd.f32 %v811_v59, %v781_v60  ;;  %v787_v42 = vmul.f32 %v1538_v5, %v1538_v5 }
 0x17e   : > { %v813_v1 = vadd.f32 %v812_v63, %v782_v25  ;;  %v745_v2 = vadd.f32 %v1532_v49, %v744_v61 }
 0x180   : > { %v746_v3 = vadd.f32 %v745_v2, %v593_v0  ;;  %v814_v4 = vadd.f32 %v813_v1, %v783_v29 }
 0x182   : > { %v815_v6 = vadd.f32 %v814_v4, %v784_v44  ;;  %v747_v8 = vadd.f32 %v746_v3, %v596_v7  ;;  %v790_v7 = vmul.f32 %v1049_v18, %v1049_v18 }
 0x184   : > { %v748_v10 = vadd.f32 %v1536_v62, %v747_v8  ;;  %v816_v11 = vadd.f32 %v815_v6, %v785_v9 }
 0x186   : > { %v817_v12 = vadd.f32 %v816_v11, %v786_v51  ;;  %v749_v13 = vadd.f32 %v1538_v5, %v748_v10 }
 0x188   : > { %v750_v49 = vadd.f32 %v749_v13, %v609_v20  ;;  %v818_v15 = vadd.f32 %v817_v12, %v787_v42 }
 0x18a   : > { %v819_v0 = vadd.f32 %v818_v15, %v788_v14  ;;  %v751_v16 = vadd.f32 %v750_v49, %v612_v30 }
 0x18c   : > { %v752_v19 = vadd.f32 %v1049_v18, %v751_v16  ;;  %v820_v21 = vadd.f32 %v819_v0, %v789_v17 }
 0x18e   : > { %v753_v62 = vadd.f32 %v1050_v26, %v752_v19  ;;  %v821_v23 = vadd.f32 %v820_v21, %v790_v7 }
 0x190   : > { %v754_v24 = vrot.slane %v753_v62, 4  ;;  %v822_v28 = vadd.f32 %v821_v23, %v791_v22 }
 0x192   : > { %v755_v32 = vadd.f32 %v754_v24, %v753_v62  ;;  %v823_v33 = vrot.slane %v822_v28, 4 }
 0x194   : > { %v756_v34 = vrot.slane %v755_v32, 2  ;;  %v824_v5 = vadd.f32 %v823_v33, %v822_v28 }
 0x196   : > { %v757_v20 = vadd.f32 %v756_v34, %v755_v32  ;;  %v825_v35 = vrot.slane %v824_v5, 2 }
 0x198   : > { %v758_v36 = vrot.slane %v757_v20, 1  ;;  %v826_v30 = vadd.f32 %v825_v35, %v824_v5 }
 0x19a   : > { %v827_v37 = vrot.slane %v826_v30, 1  ;;  %v759_v18 = vadd.f32 %v758_v36, %v757_v20 }
 0x19c   : > { %v828_v26 = vadd.f32 %v827_v37, %v826_v30 }
 0x19e   : > { %v830_v38 = vsel %vm829_vm0, %v759_v18, %v828_v26 }
 0x19f   : > { %831 = vst [vmem:[%s199_s21] sm:$0x3] %v830_v38 }
 0x1a0   : > { %1237 = shalt.err (!%p1234_p5)
}
 0x1a1   : > { %s1238_s3 = scalar_lea.hbm %s1575_s5, 32  ;;  %s1242_s16 = scalar_lea.hbm %s1626_s2, 64 }
 0x1a2   : > { %p1239_p9 = scmp.ne.s32.totalorder %s1575_s5, %s1238_s3  ;;  %p1243_p3 = scmp.lt.u32.totalorder %s1575_s5, %s1626_s2 }
 0x1a3   : > { %p1244_p7 = scmp.lt.u32.totalorder %s1242_s16, %s1238_s3  ;;  %p1246_p4 = scmp.lt.u32.totalorder %s1238_s3, %s1575_s5 }
 0x1a4   : > { %p1240_p1 = pnand %p1239_p9, %p1431_p10 }
 0x1a5   : > { %p1245_p13 = por %p1244_p7, %p1243_p3 }
 0x1a6   : > { %p1241_p2 = pneg %p1240_p1 }
 0x1a7   : > { %p1247_p6 = por %p1246_p4, %p1245_p13 }
 0x1a9   : > { %p1248_p8 = pnand %p1247_p6, %p1241_p2 }
 0x1ab   : > { %1251 = shalt.err (!%p1248_p8)
}
 0x1ac   : > { %1073 = dma.vmem_to_hbm [thread:$0]  (%p1431_p10), %s1577_s6, 32, %s1575_s5, %s833_s8  }
 0x1ad PF: > { %s858_s29 = sand.u32 1, %s1290_s9   ;;  %p1644_p12 = scmp.ne.s32.totalorder %s1634_s20, 0 }
 0x1ae   : > { %p1645_p11 = scmp.ge.s32.totalorder %s1310_s14, 2  ;;  %s859_s17 = scalar_lea.sflag [#allocation5], %s858_s29 }
 0x1b0   : > { %p1084_p0 = pnand %p1645_p11, %p1644_p12 }
 0x1b2   : > { %1285 = dma.done.wait (!%p1084_p0), %s859_s17, 32  }
 0x1b3   : > { %1287 = vsyncadd (!%p1084_p0), %s859_s17, 4294967264  ;;  %s19_s14 = sadd.s32 1, %s1310_s14   ;;  %s1646_s9 = smov %s1294_s10 }
 0x1b4   : > { %p16_p5 = scmp.ge.s32.totalorder %s19_s14, 4   ;;  %s1647_s10 = smov %s1298_s11 }
 0x1b5   : > { %s1648_s11 = smov %s1440_s28  ;;  %s1649_s12 = smov %s1306_s13 }
 0x1b6   : > { %s1650_s13 = smov %s1652_s25  ;;  %18 = sbr.rel (!%p16_p5) target bundleno = 7 (0x7), region = 86 }
 0x1bd   :  { %864 = vsyncpa [#allocation4], 1 }
 0x1be   :  { %866 = vsyncpa [#allocation4 + $0x1], 1 }
 0x1bf   :  { %867 = vsyncpa [#allocation7], 1 }
 0x1c0   :  { %868 = vsyncpa [#allocation5], 1 }
 0x1c1   :  { %870 = vsyncpa [#allocation5 + $0x1], 1 }

</bundles_post_ra>
